<compile_context>
chip_gen: v6e
topology: v6e:2x2x1
jax: 0.10.0
libtpu: 0.0.40
codegen_flags: <defaults>
</compile_context>

<pallas_src>
import jax
import jax.numpy as jnp
from jax.experimental import pallas as pl
from jax.experimental.pallas import tpu as pltpu

LANES = 128                       # every dim padded to one full lane tile
ROWS_W = 128                      # padded weight rows per layer (fan_in -> 128)
ROWS_B = 8                        # sublane-aligned row group for the bias (row 0 valid)
ROWS_PER_LAYER = ROWS_W + ROWS_B  # 136
N_LAYERS = 4
SLAB_ROWS = N_LAYERS * ROWS_PER_LAYER  # 544


def _round_up(n, m):
    return ((n + m - 1) // m) * m


def mlp_kernel(x_ref, slab_ref, o_ref):
    """Fused forward: relu(relu(relu(xW1+b1)W2+b2)W3+b3)W4+b4.

    x_ref:    (tile_m, 128) activation tile (features zero-padded to 128)
    slab_ref: (544, 128)    packed [W1|b1|W2|b2|W3|b3|W4|b4], all padded to 128
    o_ref:    (tile_m, 128) lane-dense output tile (cols >= n_output are 0)
    """
    h = x_ref[...]
    for layer in range(N_LAYERS):            # 4 iters, fully unrolled
        base = layer * ROWS_PER_LAYER
        w = slab_ref[base:base + ROWS_W, :]                    # (128, 128)
        b = slab_ref[base + ROWS_W:base + ROWS_W + 1, :]       # (1, 128)
        h = jnp.dot(h, w, preferred_element_type=jnp.float32) + b
        if layer < N_LAYERS - 1:
            h = jnp.maximum(h, 0.0)
    o_ref[...] = h.astype(o_ref.dtype)


def pack_params(params):
    """Pack (W, b) pairs (W already (fan_in, fan_out)) into one (544,128) f32 slab."""
    blocks = []
    for (w, b) in params:
        fan_in, fan_out = w.shape
        wp = jnp.zeros((ROWS_W, LANES), jnp.float32).at[:fan_in, :fan_out].set(
            w.astype(jnp.float32))
        bp = jnp.zeros((ROWS_B, LANES), jnp.float32).at[0, :fan_out].set(
            b.astype(jnp.float32))
        blocks.append(wp)
        blocks.append(bp)
    return jnp.concatenate(blocks, axis=0)


def net_forward(x, params):
    """params: list of (W, b) with W shaped (in_features, out_features)."""
    batch, n_feature = x.shape
    n_output = params[-1][0].shape[1]
    dims = [n_feature] + [w.shape[1] for (w, _) in params]

    # Batch tiling: 128-row tiles (sublane-aligned); pad batch up to a multiple.
    tm = 128 if batch >= 128 else _round_up(batch, 8)
    batch_p = _round_up(batch, tm)

    x_pad = jnp.zeros((batch_p, LANES), jnp.float32).at[:batch, :n_feature].set(
        x.astype(jnp.float32))
    slab = pack_params(params)

    flops = 2 * batch_p * sum(dims[i] * dims[i + 1] for i in range(N_LAYERS))
    bytes_accessed = int(x_pad.size * 4 + slab.size * 4 + batch_p * LANES * 4)

    out_pad = pl.pallas_call(
        mlp_kernel,
        out_shape=jax.ShapeDtypeStruct((batch_p, LANES), jnp.float32),
        grid_spec=pltpu.PrefetchScalarGridSpec(
            num_scalar_prefetch=0,
            grid=(batch_p // tm,),
            in_specs=[
                pl.BlockSpec((tm, LANES), lambda i: (i, 0)),         # activations: tiled
                pl.BlockSpec((SLAB_ROWS, LANES), lambda i: (0, 0)),  # params: resident
            ],
            out_specs=pl.BlockSpec((tm, LANES), lambda i: (i, 0)),
        ),
        compiler_params=pltpu.CompilerParams(
            dimension_semantics=("parallel",),   # shards batch tiles across TCs on v7x
        ),
        cost_estimate=pl.CostEstimate(
            flops=flops, transcendentals=0, bytes_accessed=bytes_accessed),
    )(x_pad, slab)

    return out_pad[:batch, :n_output]


def init_linear(key, fan_in, fan_out):
    """Deterministic init mimicking torch.nn.Linear default (uniform +-1/sqrt(fan_in)).
    Weight is returned already transposed to (fan_in, fan_out)."""
    kw, kb = jax.random.split(key)
    bound = 1.0 / jnp.sqrt(jnp.asarray(fan_in, jnp.float32))
    w = jax.random.uniform(kw, (fan_in, fan_out), jnp.float32, -bound, bound)
    b = jax.random.uniform(kb, (fan_out,), jnp.float32, -bound, bound)
    return w, b


if __name__ == "__main__":
    # Net(n_feature, n_hidden, n_hidden2, n_hidden3, n_output); batch exercises
    # the 128-row grid tiling (2 tiles) while staying small.
    batch = 256
    n_feature, n_hidden, n_hidden2, n_hidden3, n_output = 32, 64, 64, 32, 16

    key = jax.random.PRNGKey(0)
    kx, k1, k2, k3, k4 = jax.random.split(key, 5)

    x = jax.random.normal(kx, (batch, n_feature), jnp.float32)
    params = [
        init_linear(k1, n_feature, n_hidden),
        init_linear(k2, n_hidden, n_hidden2),
        init_linear(k3, n_hidden2, n_hidden3),
        init_linear(k4, n_hidden3, n_output),
    ]

    out = net_forward(x, params)
    jax.block_until_ready(out)

    # Pure-JAX reference check of the fused kernel.
    ref = x
    for i, (w, b) in enumerate(params):
        ref = ref @ w + b
        if i < 3:
            ref = jnp.maximum(ref, 0.0)
    assert out.shape == ref.shape, (out.shape, ref.shape)
    assert jnp.allclose(out, ref, atol=1e-4, rtol=1e-4), "mismatch vs reference"

    print("KERNEL_OK")
</pallas_src>

<mosaic_0001>
module attributes {stable_mosaic.version = 11 : i64} {
  func.func @mlp_kernel(%arg0: i32, %arg1: memref<128x128xf32, #tpu.memory_space<vmem>>, %arg2: memref<544x128xf32, #tpu.memory_space<vmem>>, %arg3: memref<128x128xf32, #tpu.memory_space<vmem>>) attributes {dimension_semantics = [#tpu.dimension_semantics<parallel>], iteration_bounds = array<i64: 2>, scalar_prefetch = 0 : i64, scratch_operands = 0 : i64, tpu.core_type = #tpu.core_type<tc>, window_params = [{transform_indices = @transform_0, window_bounds = array<i64: 128, 128>}, {pipeline_mode = #tpu.pipeline_mode<synchronous>, transform_indices = @transform_1, window_bounds = array<i64: 544, 128>}, {transform_indices = @transform_2, window_bounds = array<i64: 128, 128>}]} {
    %c0 = arith.constant 0 : index
    %c0_0 = arith.constant 0 : index
    %0 = vector.load %arg1[%c0, %c0_0] : memref<128x128xf32, #tpu.memory_space<vmem>>, vector<128x128xf32>
    %c0_1 = arith.constant 0 : index
    %c0_2 = arith.constant 0 : index
    %1 = vector.load %arg2[%c0_1, %c0_2] : memref<544x128xf32, #tpu.memory_space<vmem>>, vector<128x128xf32>
    %c128 = arith.constant 128 : index
    %c0_3 = arith.constant 0 : index
    %2 = vector.load %arg2[%c128, %c0_3] : memref<544x128xf32, #tpu.memory_space<vmem>>, vector<1x128xf32>
    %cst = arith.constant dense<0.000000e+00> : vector<128x128xf32>
    %3 = tpu.matmul %0, %1, %cst {dimension_numbers = #tpu.dot_dimension_numbers<[1], [0], [0], [1], [0, 0, 1, 1], [], []>} : vector<128x128xf32>, vector<128x128xf32>, vector<128x128xf32> -> vector<128x128xf32>
    %4 = vector.broadcast %2 : vector<1x128xf32> to vector<128x128xf32>
    %5 = arith.addf %3, %4 : vector<128x128xf32>
    %cst_4 = arith.constant 0.000000e+00 : f32
    %6 = vector.broadcast %cst_4 : f32 to vector<128x128xf32>
    %7 = arith.maximumf %5, %6 : vector<128x128xf32>
    %c136 = arith.constant 136 : index
    %c0_5 = arith.constant 0 : index
    %8 = vector.load %arg2[%c136, %c0_5] : memref<544x128xf32, #tpu.memory_space<vmem>>, vector<128x128xf32>
    %c264 = arith.constant 264 : index
    %c0_6 = arith.constant 0 : index
    %9 = vector.load %arg2[%c264, %c0_6] : memref<544x128xf32, #tpu.memory_space<vmem>>, vector<1x128xf32>
    %cst_7 = arith.constant dense<0.000000e+00> : vector<128x128xf32>
    %10 = tpu.matmul %7, %8, %cst_7 {dimension_numbers = #tpu.dot_dimension_numbers<[1], [0], [0], [1], [0, 0, 1, 1], [], []>} : vector<128x128xf32>, vector<128x128xf32>, vector<128x128xf32> -> vector<128x128xf32>
    %11 = vector.broadcast %9 : vector<1x128xf32> to vector<128x128xf32>
    %12 = arith.addf %10, %11 : vector<128x128xf32>
    %cst_8 = arith.constant 0.000000e+00 : f32
    %13 = vector.broadcast %cst_8 : f32 to vector<128x128xf32>
    %14 = arith.maximumf %12, %13 : vector<128x128xf32>
    %c272 = arith.constant 272 : index
    %c0_9 = arith.constant 0 : index
    %15 = vector.load %arg2[%c272, %c0_9] : memref<544x128xf32, #tpu.memory_space<vmem>>, vector<128x128xf32>
    %c400 = arith.constant 400 : index
    %c0_10 = arith.constant 0 : index
    %16 = vector.load %arg2[%c400, %c0_10] : memref<544x128xf32, #tpu.memory_space<vmem>>, vector<1x128xf32>
    %cst_11 = arith.constant dense<0.000000e+00> : vector<128x128xf32>
    %17 = tpu.matmul %14, %15, %cst_11 {dimension_numbers = #tpu.dot_dimension_numbers<[1], [0], [0], [1], [0, 0, 1, 1], [], []>} : vector<128x128xf32>, vector<128x128xf32>, vector<128x128xf32> -> vector<128x128xf32>
    %18 = vector.broadcast %16 : vector<1x128xf32> to vector<128x128xf32>
    %19 = arith.addf %17, %18 : vector<128x128xf32>
    %cst_12 = arith.constant 0.000000e+00 : f32
    %20 = vector.broadcast %cst_12 : f32 to vector<128x128xf32>
    %21 = arith.maximumf %19, %20 : vector<128x128xf32>
    %c408 = arith.constant 408 : index
    %c0_13 = arith.constant 0 : index
    %22 = vector.load %arg2[%c408, %c0_13] : memref<544x128xf32, #tpu.memory_space<vmem>>, vector<128x128xf32>
    %c536 = arith.constant 536 : index
    %c0_14 = arith.constant 0 : index
    %23 = vector.load %arg2[%c536, %c0_14] : memref<544x128xf32, #tpu.memory_space<vmem>>, vector<1x128xf32>
    %cst_15 = arith.constant dense<0.000000e+00> : vector<128x128xf32>
    %24 = tpu.matmul %21, %22, %cst_15 {dimension_numbers = #tpu.dot_dimension_numbers<[1], [0], [0], [1], [0, 0, 1, 1], [], []>} : vector<128x128xf32>, vector<128x128xf32>, vector<128x128xf32> -> vector<128x128xf32>
    %25 = vector.broadcast %23 : vector<1x128xf32> to vector<128x128xf32>
    %26 = arith.addf %24, %25 : vector<128x128xf32>
    %c0_16 = arith.constant 0 : index
    %c0_17 = arith.constant 0 : index
    %27 = vector.load %arg3[%c0_16, %c0_17] : memref<128x128xf32, #tpu.memory_space<vmem>>, vector<128x128xf32>
    tpu.vector_store %arg3[%c0_16, %c0_17], %26 {strides = array<i32>} : memref<128x128xf32, #tpu.memory_space<vmem>>, vector<128x128xf32>,
    return
  }
  func.func @transform_0(%arg0: i32) -> (i32, i32) {
    %c0_i32 = arith.constant 0 : i32
    %c0_i32_0 = arith.constant 0 : i32
    return %arg0, %c0_i32 : i32, i32
  }
  func.func @transform_1(%arg0: i32) -> (i32, i32) {
    %c0_i32 = arith.constant 0 : i32
    %c0_i32_0 = arith.constant 0 : i32
    %c0_i32_1 = arith.constant 0 : i32
    return %c0_i32, %c0_i32_0 : i32, i32
  }
  func.func @transform_2(%arg0: i32) -> (i32, i32) {
    %c0_i32 = arith.constant 0 : i32
    %c0_i32_0 = arith.constant 0 : i32
    return %arg0, %c0_i32 : i32, i32
  }
}

</mosaic_0001>

<bundles_post_ra>
// kernel: tpu_custom_call.1
= control target key start
LH: loop header
LB: loop body
LE: loop exit
PB: predicated region body
PF: predicated region fallthrough
CT: control target
= control target key end

     0   :  { %7 = vsyncpa [#allocation3], 0  ;;  %s1825_s0 = inlined_call_operand.hbm [shape: f32[256,128], index: 0, kind: input, shape index: {}]   ;;  %s1826_s1 = inlined_call_operand.hbm [shape: f32[544,128], index: 1, kind: input, shape index: {}]   ;;  %s1827_s2 = inlined_call_operand.hbm [shape: f32[256,128], index: 2, kind: output, shape index: {}]  }
   0x1   :  { %9 = vsyncpa [#allocation3 + $0x1], 0 }
   0x2   :  { %10 = vsyncpa [#allocation6], 0 }
   0x3   :  { %11 = vsyncpa [#allocation4], 0 }
   0x4   :  { %13 = vsyncpa [#allocation4 + $0x1], 0  ;;  %s1601_s9 = smov 0   ;;  %s1603_s10 = smov 0  }
   0x5   :  { %s1605_s11 = smov 0   ;;  %s1607_s12 = smov 0  }
   0x6 LB: > { %s1622_s13 = sadd.s32 4294967295, %s1577_s12   ;;  %s1020_s14 = sadd.s32 4294967294, %s1577_s12   ;;  %s1577_s12 = sphi %s1607_s12, %s1849_s12   ;;  %s1573_s11 = sphi %s1605_s11, %s1848_s11   ;;  %s1569_s10 = sphi %s1603_s10, %s1847_s10   ;;  %s1565_s9 = sphi %s1601_s9, %s1846_s9  }
   0x7   : > { %p39_p0 = scmp.ne.s32.totalorder %s1569_s10, %s1565_s9  ;;  %p1828_p1 = scmp.eq.s32.totalorder %s1622_s13, 0 }
   0x8   : > { %p90_p3 = scmp.eq.s32.totalorder %s1020_s14, 1  ;;  %p1021_p5 = scmp.ge.s32.totalorder %s1577_s12, 1 }
   0x9   : > { %p1631_p4 = por %p1828_p1, %p39_p0  ;;  %p97_p7 = scmp.lt.s32.totalorder %s1577_s12, 3 }
   0xa   : > { %p1636_p6 = por %p90_p3, %p39_p0  ;;  %s1579_s18 = smov [#allocation5]  }
   0xb   : > { %s1832_s15 = scalar_select %p1631_p4, 1, 0 }
   0xc   : > { %s1833_s16 = scalar_select %p1636_p6, 1, 0 }
   0xd   : > { %p1641_p8 = pnand %p1021_p5, %p97_p7  ;;  %s109_s19 = sshll.u32 %s1579_s18, 4  ;;  %s110_s19 = int_to_ptr.vmem [resolvable:$true] %s109_s19 }
   0xe   : > { %s1655_s21 = sadd.s32 1, %s1577_s12   ;;  %s26_s22 = sadd.s32 1, %s1573_s11 }
   0xf   : > { %s1834_s17 = scalar_select %p1641_p8, 1, 0 }
  0x10   : > { %p1402_p9 = pneg %p1641_p8  ;;  %s23_s23 = ssub.s32 %s1577_s12, %s1655_s21 }
  0x11   : > { %s1466_s24 = scalar_lea.vmem %s110_s19, 8704  ;;  %p1474_p5 = scmp.lt.s32.totalorder %s110_s19, %s110_s19 }
  0x12   : > { %p1650_p11 = pnand %p1402_p9, %p1828_p1  ;;  %p1467_p13 = scmp.ne.s32.totalorder %s110_s19, %s1466_s24 }
  0x13   : > { %p1475_p7 = scmp.lt.s32.totalorder %s1466_s24, %s1466_s24 }
  0x14   : > { %p1457_p12 = pneg %p1650_p11 }
  0x15   : > { %p1476_p10 = por %p1475_p7, %p1474_p5 }
  0x16   : > { %p1469_p0 = pnand %p1467_p13, %p1457_p12 }
  0x18   : > { %p1470_p3 = pneg %p1469_p0 }
  0x1a   : > { %p1477_p2 = pnand %p1476_p10, %p1470_p3 }
  0x1c   : > { %1480 = shalt.err (!%p1477_p2)
}
  0x1d   : > { %s1580_s25 = smov 128   ;;  %s1581_s26 = smov 8  }
  0x1e   : > { %1405 = dma.hbm_to_vmem [thread:$0]  (!%p1650_p11), %s1826_s1, 8704, %s110_s19, [#allocation6], %s1580_s25, %s1580_s25, %s1581_s26  }
  0x1f   : > { %p24_p2 = scmp.eq.s32.totalorder %s23_s23, 0  ;;  %p33_p9 = scmp.ne.s32.totalorder %s1573_s11, %s1569_s10 }
  0x20   : > { %p34_p10 = scmp.eq.s32.totalorder %s1577_s12, 0  ;;  %p1415_p12 = scmp.lt.s32.totalorder %s1577_s12, 2 }
  0x21   : > { %s1675_s29 = scalar_select %p24_p2, %s1573_s11, %s26_s22  }
  0x22   : > { %p35_p13 = por %p34_p10, %p33_p9  ;;  %p1836_p0 = scmp.eq.s32.totalorder %s1622_s13, 1 }
  0x23   : > { %s123_s3 = sand.u32 1, %s1573_s11   ;;  %s1040_s4 = sshll.u32 %s1577_s12, 11 }
  0x24   : > { %p1679_p3 = por %p1836_p0, %p33_p9  ;;  %s1024_s5 = sshll.u32 %s123_s3, 7 }
  0x25   : > { %s1688_s8 = scalar_lea.hbm %s1825_s0, %s1040_s4  ;;  %s127_s14 = scalar_lea.vmem [#allocation2], %s1024_s5 }
  0x26   : > { %s1837_s30 = scalar_select %p1679_p3, 1, 0 }
  0x27   : > { %s134_s18 = sshll.u32 %s127_s14, 4  ;;  %p1690_p11 = pnand %p1415_p12, %p35_p13  ;;  %s1694_s18 = int_to_ptr.vmem [resolvable:$true] %s134_s18 }
  0x28   : > { %s1696_s20 = scalar_lea.sflag [#allocation3], %s123_s3  ;;  %s1481_s22 = scalar_lea.hbm %s1688_s8, 2048 }
  0x29   : > { %p1482_p5 = scmp.ne.s32.totalorder %s1688_s8, %s1481_s22  ;;  %p1483_p7 = pneg %p1690_p11 }
  0x2a   : > { %s1486_s27 = scalar_lea.hbm %s1825_s0, 4096  ;;  %p1487_p10 = scmp.lt.s32.totalorder %s1688_s8, %s1825_s0 }
  0x2b   : > { %p1484_p2 = pnand %p1483_p7, %p1482_p5  ;;  %p1488_p12 = scmp.lt.s32.totalorder %s1486_s27, %s1481_s22 }
  0x2d   : > { %p1485_p9 = pneg %p1484_p2  ;;  %p1489_p13 = por %p1488_p12, %p1487_p10 }
  0x2f   : > { %p1490_p0 = pnand %p1489_p13, %p1485_p9 }
  0x31   : > { %1493 = shalt.err (!%p1490_p0)
}
  0x32   : > { %s1494_s3 = scalar_lea.vmem %s1694_s18, 2048  ;;  %s1582_s5 = smov [#allocation2]  }
  0x33   : > { %p1495_p1 = scmp.ne.s32.totalorder %s1694_s18, %s1494_s3  ;;  %s1499_s6 = sshll.u32 %s1582_s5, 4  ;;  %s1500_s6 = int_to_ptr.vmem [resolvable:$false] %s1499_s6 }
  0x34   : > { %s1501_s7 = scalar_lea.vmem %s1500_s6, 4096  ;;  %p1502_p2 = scmp.lt.s32.totalorder %s1694_s18, %s1500_s6 }
  0x35   : > { %p1497_p6 = pnand %p1495_p1, %p1483_p7  ;;  %p1503_p3 = scmp.lt.s32.totalorder %s1501_s7, %s1494_s3 }
  0x37   : > { %p1498_p5 = pneg %p1497_p6  ;;  %p1504_p4 = por %p1503_p3, %p1502_p2 }
  0x39   : > { %p1505_p8 = pnand %p1504_p4, %p1498_p5 }
  0x3b   : > { %1508 = shalt.err (!%p1505_p8)
}
  0x3c   : > { %1409 = dma.hbm_to_vmem [thread:$0]  (!%p1690_p11), %s1688_s8, 2048, %s1694_s18, %s1696_s20, %s1580_s25, %s1580_s25, %s1581_s26  }
  0x3d   : > { %p1839_p1 = scmp.ne.s32.totalorder %s1834_s17, 0 }
  0x3e   : > { %s1723_s14 = sand.u32 (!%p1839_p1), 1, %s1569_s10   ;;  %p1840_p4 = scmp.ne.s32.totalorder (!%p1839_p1), %s1832_s15, 0 }
  0x3f   : > { %146 = sbr.rel (%p1839_p1) target bundleno = 944 (0x3b0), region = 28  ;;  %s1028_s22 = sshll.u32 (!%p1839_p1), %s1723_s14, 7 }
  0x40   : > { %s149_s23 = scalar_lea.sflag (!%p1839_p1), [#allocation3], %s1723_s14  ;;  %s1729_s19 = scalar_lea.vmem (!%p1839_p1), [#allocation2], %s1028_s22 }
  0x44   : > { %1552 = dma.done.wait (%p1840_p4), %s149_s23, 2048  }
  0x45   : > { %1554 = vsyncadd (%p1840_p4), %s149_s23, 4294965248  ;;  %p1841_p6 = scmp.eq.s32.totalorder %s1622_s13, 0 }
  0x47   : > { %1556 = dma.done.wait (%p1841_p6), [#allocation6], 8704   ;;  %p1842_p8 = pmov %p1841_p6 }
  0x48   : > { %v210_v0 = vld [vmem:[#allocation5 + $0x78] sm:$0xff]  ;;  %v209_v1 = vld [vmem:[#allocation5 + $0x70] sm:$0xff]  ;;  %v208_v2 = vld [vmem:[#allocation5 + $0x68] sm:$0xff]  ;;  %s1757_s15 = scalar_lea.vmem [#allocation7], %s1028_s22  ;;  %s1041_s17 = sshll.u32 %s1622_s13, 11 }
  0x49   : > { %1558 = vsyncadd (%p1842_p8), [#allocation6], 4294958592  ;;  %1170 = vmatprep.subr.mxu0 %v210_v0  ;;  %v207_v3 = vld [vmem:[#allocation5 + $0x60] sm:$0xff]  ;;  %v206_v5 = vld [vmem:[#allocation5 + $0x58] sm:$0xff]  ;;  %s937_s25 = sshll.u32 %s1757_s15, 4  ;;  %s1778_s18 = scalar_lea.hbm %s1827_s2, %s1041_s17  ;;  %s1780_s25 = int_to_ptr.vmem [resolvable:$true] %s937_s25 }
  0x4a   : > { %1171 = vmatpush3.msra.mxu0 %v210_v0  ;;  %v179_v4 = vld [vmem:[%s1729_s19] sm:$0xff]  ;;  %v205_v6 = vld [vmem:[#allocation5 + $0x50] sm:$0xff]  ;;  %v204_v7 = vld [vmem:[#allocation5 + $0x48] sm:$0xff]  ;;  %s924_s20 = scalar_lea.sflag [#allocation4], %s1723_s14  ;;  %s1509_s13 = scalar_lea.vmem %s1780_s25, 2048 }
  0x4b   : > { %1172 = vmatprep.subr.mxu0 %v209_v1  ;;  %1202 = vmatprep.mubr.f32.mxu0 %v179_v4  ;;  %v392_v8 = vld [vmem:[#allocation5 + $0x100] sm:$0xff]  ;;  %v391_v9 = vld [vmem:[#allocation5 + $0xf8] sm:$0xff]  ;;  %v390_v11 = vld [vmem:[#allocation5 + $0xf0] sm:$0xff]  ;;  %p1510_p3 = scmp.ne.s32.totalorder %s1780_s25, %s1509_s13  ;;  %p1843_p11 = scmp.ne.s32.totalorder %s1837_s30, 0 }
  0x4c   : > { %1173 = vmatpush3.msra.mxu0 %v209_v1  ;;  %1226 = vmatprep.subr.mxu1 %v392_v8  ;;  %v203_v10 = vld [vmem:[#allocation5 + $0x40] sm:$0xff]  ;;  %v202_v12 = vld [vmem:[#allocation5 + $0x38] sm:$0xff]  ;;  %v389_v13 = vld [vmem:[#allocation5 + $0xe8] sm:$0xff]  ;;  %s1583_s24 = smov [#allocation7]  }
  0x4d   : > { %1174 = vmatprep.subr.mxu0 %v208_v2  ;;  %1227 = vmatpush3.msra.mxu1 %v392_v8  ;;  %v201_v14 = vld [vmem:[#allocation5 + $0x30] sm:$0xff]  ;;  %v388_v15 = vld [vmem:[#allocation5 + $0xe0] sm:$0xff]  ;;  %v200_v16 = vld [vmem:[#allocation5 + $0x28] sm:$0xff]  ;;  %p1511_p7 = pnand %p1510_p3, %p1843_p11  ;;  %s1513_s27 = sshll.u32 %s1583_s24, 4  ;;  %s1514_s27 = int_to_ptr.vmem [resolvable:$false] %s1513_s27 }
  0x4e   : > { %1175 = vmatpush3.msra.mxu0 %v208_v2  ;;  %1228 = vmatprep.subr.mxu1 %v391_v9  ;;  %v387_v17 = vld [vmem:[#allocation5 + $0xd8] sm:$0xff]  ;;  %v199_v18 = vld [vmem:[#allocation5 + $0x20] sm:$0xff]  ;;  %v386_v19 = vld [vmem:[#allocation5 + $0xd0] sm:$0xff]  ;;  %s1515_s28 = scalar_lea.vmem %s1514_s27, 4096  ;;  %p1516_p10 = scmp.lt.s32.totalorder %s1780_s25, %s1514_s27 }
  0x4f   : > { %1176 = vmatprep.subr.mxu0 %v207_v3  ;;  %1229 = vmatpush3.msra.mxu1 %v391_v9  ;;  %v198_v20 = vld [vmem:[#allocation5 + $0x18] sm:$0xff]  ;;  %v385_v21 = vld [vmem:[#allocation5 + $0xc8] sm:$0xff]  ;;  %v197_v22 = vld [vmem:[#allocation5 + $0x10] sm:$0xff]  ;;  %p1512_p9 = pneg %p1511_p7  ;;  %p1517_p12 = scmp.lt.s32.totalorder %s1515_s28, %s1509_s13 }
  0x50   : > { %1177 = vmatpush3.msra.mxu0 %v207_v3  ;;  %1230 = vmatprep.subr.mxu1 %v390_v11  ;;  %v384_v23 = vld [vmem:[#allocation5 + $0xc0] sm:$0xff]  ;;  %v196_v24 = vld [vmem:[#allocation5 + $0x8] sm:$0xff]  ;;  %v383_v25 = vld [vmem:[#allocation5 + $0xb8] sm:$0xff] }
  0x51   : > { %1178 = vmatprep.subr.mxu0 %v206_v5  ;;  %1231 = vmatpush3.msra.mxu1 %v390_v11  ;;  %v195_v26 = vld [vmem:[#allocation5] sm:$0xff]  ;;  %v382_v27 = vld [vmem:[#allocation5 + $0xb0] sm:$0xff]  ;;  %v180_v28 = vld [vmem:[%s1729_s19 + $0x8] sm:$0xff]  ;;  %p1518_p13 = por %p1517_p12, %p1516_p10 }
  0x52   : > { %1179 = vmatpush3.msra.mxu0 %v206_v5  ;;  %1232 = vmatprep.subr.mxu1 %v389_v13  ;;  %v381_v29 = vld [vmem:[#allocation5 + $0xa8] sm:$0xff]  ;;  %v181_v30 = vld [vmem:[%s1729_s19 + $0x10] sm:$0xff]  ;;  %v182_v31 = vld [vmem:[%s1729_s19 + $0x18] sm:$0xff] }
  0x53   : > { %1180 = vmatprep.subr.mxu0 %v205_v6  ;;  %1233 = vmatpush3.msra.mxu1 %v389_v13  ;;  %v183_v32 = vld [vmem:[%s1729_s19 + $0x20] sm:$0xff]  ;;  %v184_v33 = vld [vmem:[%s1729_s19 + $0x28] sm:$0xff]  ;;  %v185_v34 = vld [vmem:[%s1729_s19 + $0x30] sm:$0xff]  ;;  %p1519_p0 = pnand %p1518_p13, %p1512_p9 }
  0x54   : > { %1181 = vmatpush3.msra.mxu0 %v205_v6  ;;  %1234 = vmatprep.subr.mxu1 %v388_v15  ;;  %v186_v35 = vld [vmem:[%s1729_s19 + $0x38] sm:$0xff]  ;;  %v187_v36 = vld [vmem:[%s1729_s19 + $0x40] sm:$0xff]  ;;  %v188_v37 = vld [vmem:[%s1729_s19 + $0x48] sm:$0xff] }
  0x55   : > { %1182 = vmatprep.subr.mxu0 %v204_v7  ;;  %1235 = vmatpush3.msra.mxu1 %v388_v15  ;;  %v189_v38 = vld [vmem:[%s1729_s19 + $0x50] sm:$0xff]  ;;  %v190_v39 = vld [vmem:[%s1729_s19 + $0x58] sm:$0xff]  ;;  %v191_v40 = vld [vmem:[%s1729_s19 + $0x60] sm:$0xff] }
  0x56   : > { %1183 = vmatpush3.msra.mxu0 %v204_v7  ;;  %1236 = vmatprep.subr.mxu1 %v387_v17  ;;  %v192_v41 = vld [vmem:[%s1729_s19 + $0x68] sm:$0xff]  ;;  %v193_v42 = vld [vmem:[%s1729_s19 + $0x70] sm:$0xff]  ;;  %v194_v43 = vld [vmem:[%s1729_s19 + $0x78] sm:$0xff] }
  0x57   : > { %1184 = vmatprep.subr.mxu0 %v203_v10  ;;  %1237 = vmatpush3.msra.mxu1 %v387_v17  ;;  %v380_v44 = vld [vmem:[#allocation5 + $0xa0] sm:$0xff]  ;;  %v379_v45 = vld [vmem:[#allocation5 + $0x98] sm:$0xff]  ;;  %v378_v46 = vld [vmem:[#allocation5 + $0x90] sm:$0xff] }
  0x58   : > { %1185 = vmatpush3.msra.mxu0 %v203_v10  ;;  %1238 = vmatprep.subr.mxu1 %v386_v19  ;;  %v377_v47 = vld [vmem:[#allocation5 + $0x88] sm:$0xff]  ;;  %v573_v49 = vld [vmem:[#allocation5 + $0x180] sm:$0xff]  ;;  %v572_v50 = vld [vmem:[#allocation5 + $0x178] sm:$0xff] }
  0x59   : > { %1186 = vmatprep.subr.mxu0 %v202_v12  ;;  %1239 = vmatpush3.msra.mxu1 %v386_v19  ;;  %v574_v48 = vld [vmem:[#allocation5 + $0x188] sm:$0xff]  ;;  %v571_v51 = vld [vmem:[#allocation5 + $0x170] sm:$0xff]  ;;  %v569_v53 = vld [vmem:[#allocation5 + $0x160] sm:$0xff] }
  0x5a   : > { %1187 = vmatpush3.msra.mxu0 %v202_v12  ;;  %1240 = vmatprep.subr.mxu1 %v385_v21  ;;  %v570_v52 = vld [vmem:[#allocation5 + $0x168] sm:$0xff]  ;;  %v568_v54 = vld [vmem:[#allocation5 + $0x158] sm:$0xff]  ;;  %v567_v55 = vld [vmem:[#allocation5 + $0x150] sm:$0xff] }
  0x5b   : > { %1188 = vmatprep.subr.mxu0 %v201_v14  ;;  %1241 = vmatpush3.msra.mxu1 %v385_v21  ;;  %v566_v56 = vld [vmem:[#allocation5 + $0x148] sm:$0xff]  ;;  %v565_v57 = vld [vmem:[#allocation5 + $0x140] sm:$0xff]  ;;  %v564_v58 = vld [vmem:[#allocation5 + $0x138] sm:$0xff] }
  0x5c   : > { %1189 = vmatpush3.msra.mxu0 %v201_v14  ;;  %1242 = vmatprep.subr.mxu1 %v384_v23  ;;  %v563_v59 = vld [vmem:[#allocation5 + $0x130] sm:$0xff]  ;;  %v562_v60 = vld [vmem:[#allocation5 + $0x128] sm:$0xff]  ;;  %v1031_v61 = vld [vmem:[#allocation5 + $0x80] ss:$0 sm:$0xff] }
  0x5d   : > { %1190 = vmatprep.subr.mxu0 %v200_v16  ;;  %1243 = vmatpush3.msra.mxu1 %v384_v23 }
  0x5e   : > { %1191 = vmatpush3.msra.mxu0 %v200_v16  ;;  %1244 = vmatprep.subr.mxu1 %v383_v25 }
  0x5f   : > { %1192 = vmatprep.subr.mxu0 %v199_v18  ;;  %1245 = vmatpush3.msra.mxu1 %v383_v25 }
  0x60   : > { %1193 = vmatpush3.msra.mxu0 %v199_v18  ;;  %1246 = vmatprep.subr.mxu1 %v382_v27 }
  0x61   : > { %1194 = vmatprep.subr.mxu0 %v198_v20  ;;  %1247 = vmatpush3.msra.mxu1 %v382_v27 }
  0x62   : > { %1195 = vmatpush3.msra.mxu0 %v198_v20  ;;  %1248 = vmatprep.subr.mxu1 %v381_v29 }
  0x63   : > { %1196 = vmatprep.subr.mxu0 %v197_v22  ;;  %1249 = vmatpush3.msra.mxu1 %v381_v29 }
  0x64   : > { %1197 = vmatpush3.msra.mxu0 %v197_v22  ;;  %1250 = vmatprep.subr.mxu1 %v380_v44 }
  0x65   : > { %1198 = vmatprep.subr.mxu0 %v196_v24  ;;  %1251 = vmatpush3.msra.mxu1 %v380_v44 }
  0x66   : > { %1199 = vmatpush3.msra.mxu0 %v196_v24  ;;  %1252 = vmatprep.subr.mxu1 %v379_v45 }
  0x67   : > { %1200 = vmatprep.subr.mxu0 %v195_v26  ;;  %1253 = vmatpush3.msra.mxu1 %v379_v45 }
  0x68   : > { %1201 = vmatpush3.msra.mxu0 %v195_v26  ;;  %1254 = vmatprep.subr.mxu1 %v378_v46 }
  0x69   : > { %1203 = vmatmul.mubr.f32.vlgmr.msra.gmra.mxu0 %v180_v28  ;;  %1255 = vmatpush3.msra.mxu1 %v378_v46  ;;  %v561_v46 = vld [vmem:[#allocation5 + $0x120] sm:$0xff] }
  0x6a   : > { %1205 = vmatprep.mubr.f32.mxu0 %v181_v30  ;;  %1256 = vmatprep.subr.mxu1 %v377_v47 }
  0x6b   : > { %1257 = vmatpush3.msra.mxu1 %v377_v47  ;;  %1282 = vmatprep.subr.mxu0 %v574_v48  ;;  %v560_v47 = vld [vmem:[#allocation5 + $0x118] sm:$0xff] }
  0x6c   : > { %1283 = vmatpush3.msra.mxu0 %v574_v48  ;;  %v559_v48 = vld [vmem:[#allocation5 + $0x110] sm:$0xff] }
  0x6d   : > { %1206 = vmatmul.mubr.f32.gmra.mxu0 %v182_v31  ;;  %1284 = vmatprep.subr.mxu0 %v573_v49 }
  0x6e   : > { %1208 = vmatprep.mubr.f32.mxu0 %v183_v32  ;;  %1285 = vmatpush3.msra.mxu0 %v573_v49  ;;  %v756_v49 = vld [vmem:[#allocation5 + $0x210] sm:$0xff] }
  0x6f   : > { %1286 = vmatprep.subr.mxu0 %v572_v50  ;;  %1338 = vmatprep.subr.mxu1 %v756_v49 }
  0x70   : > { %1287 = vmatpush3.msra.mxu0 %v572_v50  ;;  %v755_v50 = vld [vmem:[#allocation5 + $0x208] sm:$0xff] }
  0x71   : > { %1209 = vmatmul.mubr.f32.gmra.mxu0 %v184_v33  ;;  %1288 = vmatprep.subr.mxu0 %v571_v51 }
  0x72   : > { %1211 = vmatprep.mubr.f32.mxu0 %v185_v34  ;;  %1289 = vmatpush3.msra.mxu0 %v571_v51  ;;  %v754_v51 = vld [vmem:[#allocation5 + $0x200] sm:$0xff] }
  0x73   : > { %1290 = vmatprep.subr.mxu0 %v570_v52 }
  0x74   : > { %1291 = vmatpush3.msra.mxu0 %v570_v52  ;;  %v753_v52 = vld [vmem:[#allocation5 + $0x1f8] sm:$0xff] }
  0x75   : > { %1212 = vmatmul.mubr.f32.gmra.mxu0 %v186_v35  ;;  %1292 = vmatprep.subr.mxu0 %v569_v53 }
  0x76   : > { %1214 = vmatprep.mubr.f32.mxu0 %v187_v36  ;;  %1293 = vmatpush3.msra.mxu0 %v569_v53  ;;  %v752_v53 = vld [vmem:[#allocation5 + $0x1f0] sm:$0xff] }
  0x77   : > { %1294 = vmatprep.subr.mxu0 %v568_v54 }
  0x78   : > { %1295 = vmatpush3.msra.mxu0 %v568_v54  ;;  %v751_v54 = vld [vmem:[#allocation5 + $0x1e8] sm:$0xff] }
  0x79   : > { %1215 = vmatmul.mubr.f32.gmra.mxu0 %v188_v37  ;;  %1296 = vmatprep.subr.mxu0 %v567_v55 }
  0x7a   : > { %1217 = vmatprep.mubr.f32.mxu0 %v189_v38  ;;  %1297 = vmatpush3.msra.mxu0 %v567_v55  ;;  %v750_v55 = vld [vmem:[#allocation5 + $0x1e0] sm:$0xff] }
  0x7b   : > { %1298 = vmatprep.subr.mxu0 %v566_v56 }
  0x7c   : > { %1299 = vmatpush3.msra.mxu0 %v566_v56  ;;  %v749_v56 = vld [vmem:[#allocation5 + $0x1d8] sm:$0xff] }
  0x7d   : > { %1218 = vmatmul.mubr.f32.gmra.mxu0 %v190_v39  ;;  %1300 = vmatprep.subr.mxu0 %v565_v57 }
  0x7e   : > { %1220 = vmatprep.mubr.f32.mxu0 %v191_v40  ;;  %1301 = vmatpush3.msra.mxu0 %v565_v57  ;;  %v748_v57 = vld [vmem:[#allocation5 + $0x1d0] sm:$0xff] }
  0x7f   : > { %1302 = vmatprep.subr.mxu0 %v564_v58 }
  0x80   : > { %1303 = vmatpush3.msra.mxu0 %v564_v58  ;;  %v747_v58 = vld [vmem:[#allocation5 + $0x1c8] sm:$0xff] }
  0x81   : > { %1221 = vmatmul.mubr.f32.gmra.mxu0 %v192_v41  ;;  %1304 = vmatprep.subr.mxu0 %v563_v59 }
  0x82   : > { %1223 = vmatprep.mubr.f32.mxu0 %v193_v42  ;;  %1305 = vmatpush3.msra.mxu0 %v563_v59  ;;  %v746_v59 = vld [vmem:[#allocation5 + $0x1c0] sm:$0xff] }
  0x83   : > { %1306 = vmatprep.subr.mxu0 %v562_v60 }
  0x84   : > { %1307 = vmatpush3.msra.mxu0 %v562_v60  ;;  %v745_v60 = vld [vmem:[#allocation5 + $0x1b8] sm:$0xff] }
  0x85   : > { %1224 = vmatmul.mubr.f32.gmra.mxu0 %v194_v43  ;;  %1308 = vmatprep.subr.mxu0 %v561_v46 }
  0x86   : > { %1309 = vmatpush3.msra.mxu0 %v561_v46 }
  0x87   : > { %1310 = vmatprep.subr.mxu0 %v560_v47 }
  0x88   : > { %1311 = vmatpush3.msra.mxu0 %v560_v47  ;;  %v743_v47 = vld [vmem:[#allocation5 + $0x1a8] sm:$0xff] }
  0x89   : > { %1312 = vmatprep.subr.mxu0 %v559_v48 }
  0x8a   : > { %1313 = vmatpush3.msra.mxu0 %v559_v48  ;;  %v742_v48 = vld [vmem:[#allocation5 + $0x1a0] sm:$0xff] }
 0x129   : > { %v1204_v62 = vpop.f32.mrf.mxu0 }
 0x12a   : > { %v288_v63 = vadd.f32 %v1204_v62, %v1031_v61  ;;  %v1032_v62 = vld [vmem:[#allocation5 + $0x108] ss:$0 sm:$0xff] }
 0x12b   : > { %v282_v0 = vpop.f32.mrf.mxu0 }
 0x12c   : > { %v283_v1 = vadd.f32 %v1031_v61, %v282_v0  ;;  %v362_v4 = vmax.f32 %v288_v63, 0.0 }
 0x12d   : > { %v1207_v2 = vpop.f32.mrf.mxu0 }
 0x12e   : > { %v361_v3 = vmax.f32 %v283_v1, 0.0  ;;  %v298_v5 = vadd.f32 %v1207_v2, %v1031_v61 }
 0x12f   : > { %v292_v6 = vpop.f32.mrf.mxu0 }
 0x130   : > { %v293_v7 = vadd.f32 %v1031_v61, %v292_v6  ;;  %1258 = vmatprep.mubr.f32.mxu1 %v361_v3  ;;  %v364_v10 = vmax.f32 %v298_v5, 0.0 }
 0x131   : > { %v1210_v8 = vpop.f32.mrf.mxu0  ;;  %1259 = vmatmul.mubr.f32.vlgmr.msra.gmra.mxu1 %v362_v4 }
 0x132   : > { %v363_v9 = vmax.f32 %v293_v7, 0.0  ;;  %v308_v11 = vadd.f32 %v1210_v8, %v1031_v61  ;;  %1339 = vmatpush3.msra.mxu1 %v756_v49  ;;  %v741_v49 = vld [vmem:[#allocation5 + $0x198] sm:$0xff] }
 0x133   : > { %v302_v12 = vpop.f32.mrf.mxu0  ;;  %1340 = vmatprep.subr.mxu1 %v755_v50 }
 0x134   : > { %v303_v13 = vadd.f32 %v1031_v61, %v302_v12  ;;  %1261 = vmatprep.mubr.f32.mxu1 %v363_v9  ;;  %v366_v16 = vmax.f32 %v308_v11, 0.0  ;;  %1341 = vmatpush3.msra.mxu1 %v755_v50  ;;  %v1033_v50 = vld [vmem:[#allocation5 + $0x190] ss:$0 sm:$0xff] }
 0x135   : > { %v1213_v14 = vpop.f32.mrf.mxu0  ;;  %1262 = vmatmul.mubr.f32.gmra.mxu1 %v364_v10  ;;  %1342 = vmatprep.subr.mxu1 %v754_v51 }
 0x136   : > { %v365_v15 = vmax.f32 %v303_v13, 0.0  ;;  %v318_v17 = vadd.f32 %v1213_v14, %v1031_v61  ;;  %1343 = vmatpush3.msra.mxu1 %v754_v51 }
 0x137   : > { %v312_v18 = vpop.f32.mrf.mxu0  ;;  %1344 = vmatprep.subr.mxu1 %v753_v52 }
 0x138   : > { %v313_v19 = vadd.f32 %v1031_v61, %v312_v18  ;;  %1264 = vmatprep.mubr.f32.mxu1 %v365_v15  ;;  %v368_v22 = vmax.f32 %v318_v17, 0.0  ;;  %1345 = vmatpush3.msra.mxu1 %v753_v52 }
 0x139   : > { %v1216_v20 = vpop.f32.mrf.mxu0  ;;  %1265 = vmatmul.mubr.f32.gmra.mxu1 %v366_v16  ;;  %1346 = vmatprep.subr.mxu1 %v752_v53 }
 0x13a   : > { %v367_v21 = vmax.f32 %v313_v19, 0.0  ;;  %v328_v23 = vadd.f32 %v1216_v20, %v1031_v61  ;;  %1347 = vmatpush3.msra.mxu1 %v752_v53 }
 0x13b   : > { %v322_v24 = vpop.f32.mrf.mxu0  ;;  %1348 = vmatprep.subr.mxu1 %v751_v54 }
 0x13c   : > { %v323_v25 = vadd.f32 %v1031_v61, %v322_v24  ;;  %1267 = vmatprep.mubr.f32.mxu1 %v367_v21  ;;  %v370_v28 = vmax.f32 %v328_v23, 0.0  ;;  %1349 = vmatpush3.msra.mxu1 %v751_v54 }
 0x13d   : > { %v1219_v26 = vpop.f32.mrf.mxu0  ;;  %1268 = vmatmul.mubr.f32.gmra.mxu1 %v368_v22  ;;  %1350 = vmatprep.subr.mxu1 %v750_v55 }
 0x13e   : > { %v369_v27 = vmax.f32 %v323_v25, 0.0  ;;  %v338_v29 = vadd.f32 %v1219_v26, %v1031_v61  ;;  %1351 = vmatpush3.msra.mxu1 %v750_v55 }
 0x13f   : > { %v332_v30 = vpop.f32.mrf.mxu0  ;;  %1352 = vmatprep.subr.mxu1 %v749_v56 }
 0x140   : > { %v333_v31 = vadd.f32 %v1031_v61, %v332_v30  ;;  %1270 = vmatprep.mubr.f32.mxu1 %v369_v27  ;;  %v372_v34 = vmax.f32 %v338_v29, 0.0  ;;  %1353 = vmatpush3.msra.mxu1 %v749_v56 }
 0x141   : > { %v1222_v32 = vpop.f32.mrf.mxu0  ;;  %1271 = vmatmul.mubr.f32.gmra.mxu1 %v370_v28  ;;  %1354 = vmatprep.subr.mxu1 %v748_v57 }
 0x142   : > { %v371_v33 = vmax.f32 %v333_v31, 0.0  ;;  %v348_v35 = vadd.f32 %v1222_v32, %v1031_v61  ;;  %1355 = vmatpush3.msra.mxu1 %v748_v57 }
 0x143   : > { %v342_v36 = vpop.f32.mrf.mxu0  ;;  %1356 = vmatprep.subr.mxu1 %v747_v58 }
 0x144   : > { %v343_v37 = vadd.f32 %v1031_v61, %v342_v36  ;;  %1273 = vmatprep.mubr.f32.mxu1 %v371_v33  ;;  %v374_v40 = vmax.f32 %v348_v35, 0.0  ;;  %1357 = vmatpush3.msra.mxu1 %v747_v58 }
 0x145   : > { %v1225_v38 = vpop.f32.mrf.mxu0  ;;  %1274 = vmatmul.mubr.f32.gmra.mxu1 %v372_v34  ;;  %1358 = vmatprep.subr.mxu1 %v746_v59 }
 0x146   : > { %v373_v39 = vmax.f32 %v343_v37, 0.0  ;;  %v358_v41 = vadd.f32 %v1225_v38, %v1031_v61  ;;  %1359 = vmatpush3.msra.mxu1 %v746_v59 }
 0x147   : > { %v352_v42 = vpop.f32.mrf.mxu0  ;;  %1360 = vmatprep.subr.mxu1 %v745_v60 }
 0x148   : > { %v353_v43 = vadd.f32 %v1031_v61, %v352_v42  ;;  %1276 = vmatprep.mubr.f32.mxu1 %v373_v39  ;;  %v376_v45 = vmax.f32 %v358_v41, 0.0  ;;  %v744_v61 = vld [vmem:[#allocation5 + $0x1b0] sm:$0xff]  ;;  %1361 = vmatpush3.msra.mxu1 %v745_v60 }
 0x149   : > { %1277 = vmatmul.mubr.f32.gmra.mxu1 %v374_v40  ;;  %1362 = vmatprep.subr.mxu1 %v744_v61 }
 0x14a   : > { %v375_v44 = vmax.f32 %v353_v43, 0.0  ;;  %1363 = vmatpush3.msra.mxu1 %v744_v61 }
 0x14b   : > { %1364 = vmatprep.subr.mxu1 %v743_v47 }
 0x14c   : > { %1279 = vmatprep.mubr.f32.mxu1 %v375_v44  ;;  %1365 = vmatpush3.msra.mxu1 %v743_v47 }
 0x14d   : > { %1280 = vmatmul.mubr.f32.gmra.mxu1 %v376_v45  ;;  %1366 = vmatprep.subr.mxu1 %v742_v48 }
 0x14e   : > { %1367 = vmatpush3.msra.mxu1 %v742_v48 }
 0x14f   : > { %1368 = vmatprep.subr.mxu1 %v741_v49 }
 0x150   : > { %1369 = vmatpush3.msra.mxu1 %v741_v49 }
 0x1f1   : > { %v1260_v63 = vpop.f32.mrf.mxu1 }
 0x1f2   : > { %v470_v0 = vadd.f32 %v1260_v63, %v1032_v62 }
 0x1f3   : > { %v464_v1 = vpop.f32.mrf.mxu1 }
 0x1f4   : > { %v465_v2 = vadd.f32 %v1032_v62, %v464_v1  ;;  %v544_v5 = vmax.f32 %v470_v0, 0.0 }
 0x1f5   : > { %v1263_v3 = vpop.f32.mrf.mxu1 }
 0x1f6   : > { %v543_v4 = vmax.f32 %v465_v2, 0.0  ;;  %v480_v6 = vadd.f32 %v1263_v3, %v1032_v62 }
 0x1f7   : > { %v474_v7 = vpop.f32.mrf.mxu1 }
 0x1f8   : > { %v475_v8 = vadd.f32 %v1032_v62, %v474_v7  ;;  %1314 = vmatprep.mubr.f32.mxu0 %v543_v4  ;;  %v546_v11 = vmax.f32 %v480_v6, 0.0 }
 0x1f9   : > { %v1266_v9 = vpop.f32.mrf.mxu1  ;;  %1315 = vmatmul.mubr.f32.vlgmr.msra.gmra.mxu0 %v544_v5 }
 0x1fa   : > { %v545_v10 = vmax.f32 %v475_v8, 0.0  ;;  %v490_v12 = vadd.f32 %v1266_v9, %v1032_v62 }
 0x1fb   : > { %v484_v13 = vpop.f32.mrf.mxu1 }
 0x1fc   : > { %v485_v14 = vadd.f32 %v1032_v62, %v484_v13  ;;  %1317 = vmatprep.mubr.f32.mxu0 %v545_v10  ;;  %v548_v17 = vmax.f32 %v490_v12, 0.0 }
 0x1fd   : > { %v1269_v15 = vpop.f32.mrf.mxu1  ;;  %1318 = vmatmul.mubr.f32.gmra.mxu0 %v546_v11 }
 0x1fe   : > { %v547_v16 = vmax.f32 %v485_v14, 0.0  ;;  %v500_v18 = vadd.f32 %v1269_v15, %v1032_v62 }
 0x1ff   : > { %v494_v19 = vpop.f32.mrf.mxu1 }
 0x200   : > { %v495_v20 = vadd.f32 %v1032_v62, %v494_v19  ;;  %1320 = vmatprep.mubr.f32.mxu0 %v547_v16  ;;  %v550_v23 = vmax.f32 %v500_v18, 0.0 }
 0x201   : > { %v1272_v21 = vpop.f32.mrf.mxu1  ;;  %1321 = vmatmul.mubr.f32.gmra.mxu0 %v548_v17 }
 0x202   : > { %v549_v22 = vmax.f32 %v495_v20, 0.0  ;;  %v510_v24 = vadd.f32 %v1272_v21, %v1032_v62 }
 0x203   : > { %v504_v25 = vpop.f32.mrf.mxu1 }
 0x204   : > { %v505_v26 = vadd.f32 %v1032_v62, %v504_v25  ;;  %1323 = vmatprep.mubr.f32.mxu0 %v549_v22  ;;  %v552_v29 = vmax.f32 %v510_v24, 0.0 }
 0x205   : > { %v1275_v27 = vpop.f32.mrf.mxu1  ;;  %1324 = vmatmul.mubr.f32.gmra.mxu0 %v550_v23 }
 0x206   : > { %v551_v28 = vmax.f32 %v505_v26, 0.0  ;;  %v520_v30 = vadd.f32 %v1275_v27, %v1032_v62 }
 0x207   : > { %v514_v31 = vpop.f32.mrf.mxu1 }
 0x208   : > { %v515_v32 = vadd.f32 %v1032_v62, %v514_v31  ;;  %1326 = vmatprep.mubr.f32.mxu0 %v551_v28  ;;  %v554_v35 = vmax.f32 %v520_v30, 0.0 }
 0x209   : > { %v1278_v33 = vpop.f32.mrf.mxu1  ;;  %1327 = vmatmul.mubr.f32.gmra.mxu0 %v552_v29 }
 0x20a   : > { %v553_v34 = vmax.f32 %v515_v32, 0.0  ;;  %v530_v36 = vadd.f32 %v1278_v33, %v1032_v62 }
 0x20b   : > { %v524_v37 = vpop.f32.mrf.mxu1 }
 0x20c   : > { %v525_v38 = vadd.f32 %v1032_v62, %v524_v37  ;;  %1329 = vmatprep.mubr.f32.mxu0 %v553_v34  ;;  %v556_v41 = vmax.f32 %v530_v36, 0.0 }
 0x20d   : > { %v1281_v39 = vpop.f32.mrf.mxu1  ;;  %1330 = vmatmul.mubr.f32.gmra.mxu0 %v554_v35  ;;  %v1034_v35 = vld [vmem:[#allocation5 + $0x218] ss:$0 sm:$0xff] }
 0x20e   : > { %v555_v40 = vmax.f32 %v525_v38, 0.0  ;;  %v540_v42 = vadd.f32 %v1281_v39, %v1032_v62 }
 0x20f   : > { %v534_v43 = vpop.f32.mrf.mxu1 }
 0x210   : > { %v535_v44 = vadd.f32 %v1032_v62, %v534_v43  ;;  %1332 = vmatprep.mubr.f32.mxu0 %v555_v40  ;;  %v558_v46 = vmax.f32 %v540_v42, 0.0 }
 0x211   : > { %1333 = vmatmul.mubr.f32.gmra.mxu0 %v556_v41 }
 0x212   : > { %v557_v45 = vmax.f32 %v535_v44, 0.0 }
 0x214   : > { %1335 = vmatprep.mubr.f32.mxu0 %v557_v45 }
 0x215   : > { %1336 = vmatmul.mubr.f32.gmra.mxu0 %v558_v46 }
 0x2b9   : > { %v1316_v51 = vpop.f32.mrf.mxu0 }
 0x2ba   : > { %v652_v52 = vadd.f32 %v1316_v51, %v1033_v50 }
 0x2bb   : > { %v646_v53 = vpop.f32.mrf.mxu0 }
 0x2bc   : > { %v647_v54 = vadd.f32 %v1033_v50, %v646_v53  ;;  %v726_v57 = vmax.f32 %v652_v52, 0.0 }
 0x2bd   : > { %v1319_v55 = vpop.f32.mrf.mxu0 }
 0x2be   : > { %v725_v56 = vmax.f32 %v647_v54, 0.0  ;;  %v662_v58 = vadd.f32 %v1319_v55, %v1033_v50 }
 0x2bf   : > { %v656_v59 = vpop.f32.mrf.mxu0 }
 0x2c0   : > { %v657_v60 = vadd.f32 %v1033_v50, %v656_v59  ;;  %1370 = vmatprep.mubr.f32.mxu1 %v725_v56  ;;  %v728_v63 = vmax.f32 %v662_v58, 0.0 }
 0x2c1   : > { %v1322_v61 = vpop.f32.mrf.mxu0  ;;  %1371 = vmatmul.mubr.f32.vlgmr.msra.gmra.mxu1 %v726_v57 }
 0x2c2   : > { %v727_v62 = vmax.f32 %v657_v60, 0.0  ;;  %v672_v0 = vadd.f32 %v1322_v61, %v1033_v50 }
 0x2c3   : > { %v666_v1 = vpop.f32.mrf.mxu0 }
 0x2c4   : > { %v667_v2 = vadd.f32 %v1033_v50, %v666_v1  ;;  %1373 = vmatprep.mubr.f32.mxu1 %v727_v62  ;;  %v730_v5 = vmax.f32 %v672_v0, 0.0 }
 0x2c5   : > { %v1325_v3 = vpop.f32.mrf.mxu0  ;;  %1374 = vmatmul.mubr.f32.gmra.mxu1 %v728_v63 }
 0x2c6   : > { %v729_v4 = vmax.f32 %v667_v2, 0.0  ;;  %v682_v6 = vadd.f32 %v1325_v3, %v1033_v50 }
 0x2c7   : > { %v676_v7 = vpop.f32.mrf.mxu0 }
 0x2c8   : > { %v677_v8 = vadd.f32 %v1033_v50, %v676_v7  ;;  %1376 = vmatprep.mubr.f32.mxu1 %v729_v4  ;;  %v732_v11 = vmax.f32 %v682_v6, 0.0 }
 0x2c9   : > { %v1328_v9 = vpop.f32.mrf.mxu0  ;;  %1377 = vmatmul.mubr.f32.gmra.mxu1 %v730_v5 }
 0x2ca   : > { %v731_v10 = vmax.f32 %v677_v8, 0.0  ;;  %v692_v12 = vadd.f32 %v1328_v9, %v1033_v50 }
 0x2cb   : > { %v686_v13 = vpop.f32.mrf.mxu0 }
 0x2cc   : > { %v687_v14 = vadd.f32 %v1033_v50, %v686_v13  ;;  %1379 = vmatprep.mubr.f32.mxu1 %v731_v10  ;;  %v734_v17 = vmax.f32 %v692_v12, 0.0 }
 0x2cd   : > { %v1331_v15 = vpop.f32.mrf.mxu0  ;;  %1380 = vmatmul.mubr.f32.gmra.mxu1 %v732_v11 }
 0x2ce   : > { %v733_v16 = vmax.f32 %v687_v14, 0.0  ;;  %v702_v18 = vadd.f32 %v1331_v15, %v1033_v50 }
 0x2cf   : > { %v696_v19 = vpop.f32.mrf.mxu0 }
 0x2d0   : > { %v697_v20 = vadd.f32 %v1033_v50, %v696_v19  ;;  %1382 = vmatprep.mubr.f32.mxu1 %v733_v16  ;;  %v736_v23 = vmax.f32 %v702_v18, 0.0 }
 0x2d1   : > { %v1334_v21 = vpop.f32.mrf.mxu0  ;;  %1383 = vmatmul.mubr.f32.gmra.mxu1 %v734_v17 }
 0x2d2   : > { %v735_v22 = vmax.f32 %v697_v20, 0.0  ;;  %v712_v24 = vadd.f32 %v1334_v21, %v1033_v50 }
 0x2d3   : > { %v706_v25 = vpop.f32.mrf.mxu0 }
 0x2d4   : > { %v707_v26 = vadd.f32 %v1033_v50, %v706_v25  ;;  %1385 = vmatprep.mubr.f32.mxu1 %v735_v22  ;;  %v738_v29 = vmax.f32 %v712_v24, 0.0 }
 0x2d5   : > { %v1337_v27 = vpop.f32.mrf.mxu0  ;;  %1386 = vmatmul.mubr.f32.gmra.mxu1 %v736_v23 }
 0x2d6   : > { %v737_v28 = vmax.f32 %v707_v26, 0.0  ;;  %v722_v30 = vadd.f32 %v1337_v27, %v1033_v50 }
 0x2d7   : > { %v716_v31 = vpop.f32.mrf.mxu0 }
 0x2d8   : > { %v717_v32 = vadd.f32 %v1033_v50, %v716_v31  ;;  %1388 = vmatprep.mubr.f32.mxu1 %v737_v28  ;;  %v740_v34 = vmax.f32 %v722_v30, 0.0 }
 0x2d9   : > { %1389 = vmatmul.mubr.f32.gmra.mxu1 %v738_v29 }
 0x2da   : > { %v739_v33 = vmax.f32 %v717_v32, 0.0 }
 0x2dc   : > { %1391 = vmatprep.mubr.f32.mxu1 %v739_v33 }
 0x2dd   : > { %1392 = vmatmul.mubr.f32.gmra.mxu1 %v740_v34 }
 0x381   : > { %v1372_v36 = vpop.f32.mrf.mxu1 }
 0x382   : > { %v834_v37 = vadd.f32 %v1372_v36, %v1034_v35 }
 0x383   : > { %v828_v38 = vpop.f32.mrf.mxu1 }
 0x384   : > { %908 = vst [vmem:[%s1757_s15 + $0x8] sm:$0xff] %v834_v37  ;;  %v829_v39 = vadd.f32 %v1034_v35, %v828_v38 }
 0x385   : > { %v1375_v40 = vpop.f32.mrf.mxu1 }
 0x386   : > { %907 = vst [vmem:[%s1757_s15] sm:$0xff] %v829_v39  ;;  %v844_v41 = vadd.f32 %v1375_v40, %v1034_v35 }
 0x387   : > { %v838_v42 = vpop.f32.mrf.mxu1 }
 0x388   : > { %910 = vst [vmem:[%s1757_s15 + $0x18] sm:$0xff] %v844_v41  ;;  %v839_v43 = vadd.f32 %v1034_v35, %v838_v42 }
 0x389   : > { %v1378_v44 = vpop.f32.mrf.mxu1 }
 0x38a   : > { %909 = vst [vmem:[%s1757_s15 + $0x10] sm:$0xff] %v839_v43  ;;  %v854_v45 = vadd.f32 %v1378_v44, %v1034_v35 }
 0x38b   : > { %v848_v46 = vpop.f32.mrf.mxu1 }
 0x38c   : > { %912 = vst [vmem:[%s1757_s15 + $0x28] sm:$0xff] %v854_v45  ;;  %v849_v47 = vadd.f32 %v1034_v35, %v848_v46 }
 0x38d   : > { %v1381_v48 = vpop.f32.mrf.mxu1 }
 0x38e   : > { %911 = vst [vmem:[%s1757_s15 + $0x20] sm:$0xff] %v849_v47  ;;  %v864_v49 = vadd.f32 %v1381_v48, %v1034_v35 }
 0x38f   : > { %v858_v50 = vpop.f32.mrf.mxu1 }
 0x390   : > { %914 = vst [vmem:[%s1757_s15 + $0x38] sm:$0xff] %v864_v49  ;;  %v859_v51 = vadd.f32 %v1034_v35, %v858_v50 }
 0x391   : > { %v1384_v52 = vpop.f32.mrf.mxu1 }
 0x392   : > { %913 = vst [vmem:[%s1757_s15 + $0x30] sm:$0xff] %v859_v51  ;;  %v874_v53 = vadd.f32 %v1384_v52, %v1034_v35 }
 0x393   : > { %v868_v54 = vpop.f32.mrf.mxu1 }
 0x394   : > { %916 = vst [vmem:[%s1757_s15 + $0x48] sm:$0xff] %v874_v53  ;;  %v869_v55 = vadd.f32 %v1034_v35, %v868_v54 }
 0x395   : > { %v1387_v56 = vpop.f32.mrf.mxu1 }
 0x396   : > { %915 = vst [vmem:[%s1757_s15 + $0x40] sm:$0xff] %v869_v55  ;;  %v884_v57 = vadd.f32 %v1387_v56, %v1034_v35 }
 0x397   : > { %v878_v58 = vpop.f32.mrf.mxu1 }
 0x398   : > { %918 = vst [vmem:[%s1757_s15 + $0x58] sm:$0xff] %v884_v57  ;;  %v879_v59 = vadd.f32 %v1034_v35, %v878_v58 }
 0x399   : > { %v1390_v60 = vpop.f32.mrf.mxu1 }
 0x39a   : > { %917 = vst [vmem:[%s1757_s15 + $0x50] sm:$0xff] %v879_v59  ;;  %v894_v61 = vadd.f32 %v1390_v60, %v1034_v35 }
 0x39b   : > { %v888_v62 = vpop.f32.mrf.mxu1 }
 0x39c   : > { %920 = vst [vmem:[%s1757_s15 + $0x68] sm:$0xff] %v894_v61  ;;  %v889_v63 = vadd.f32 %v1034_v35, %v888_v62 }
 0x39d   : > { %v1393_v0 = vpop.f32.mrf.mxu1 }
 0x39e   : > { %919 = vst [vmem:[%s1757_s15 + $0x60] sm:$0xff] %v889_v63  ;;  %v904_v1 = vadd.f32 %v1393_v0, %v1034_v35 }
 0x39f   : > { %v898_v2 = vpop.f32.mrf.mxu1 }
 0x3a0   : > { %922 = vst [vmem:[%s1757_s15 + $0x78] sm:$0xff] %v904_v1  ;;  %v899_v3 = vadd.f32 %v1034_v35, %v898_v2 }
 0x3a2   : > { %921 = vst [vmem:[%s1757_s15 + $0x70] sm:$0xff] %v899_v3 }
 0x3a3   : > { %1522 = shalt.err (!%p1519_p0)
}
 0x3a4   : > { %s1523_s4 = scalar_lea.hbm %s1778_s18, 2048  ;;  %s1527_s6 = scalar_lea.hbm %s1827_s2, 4096 }
 0x3a5   : > { %p1524_p5 = scmp.ne.s32.totalorder %s1778_s18, %s1523_s4  ;;  %p1528_p4 = scmp.lt.s32.totalorder %s1778_s18, %s1827_s2 }
 0x3a6   : > { %p1529_p6 = scmp.lt.s32.totalorder %s1527_s6, %s1523_s4 }
 0x3a7   : > { %p1525_p2 = pnand %p1524_p5, %p1843_p11 }
 0x3a8   : > { %p1530_p8 = por %p1529_p6, %p1528_p4 }
 0x3a9   : > { %p1526_p1 = pneg %p1525_p2 }
 0x3ab   : > { %p1531_p3 = pnand %p1530_p8, %p1526_p1 }
 0x3ad   : > { %1534 = shalt.err (!%p1531_p3)
}
 0x3ae   : > { %s1584_s23 = smov 128   ;;  %s1585_s19 = smov 8  }
 0x3af   : > { %1400 = dma.vmem_to_hbm [thread:$0]  (%p1843_p11), %s1780_s25, 2048, %s1778_s18, %s924_s20, %s1584_s23, %s1584_s23, %s1585_s19  }
 0x3b0 PF: > { %s952_s15 = sand.u32 1, %s1565_s9   ;;  %p1844_p7 = scmp.ne.s32.totalorder %s1833_s16, 0 }
 0x3b1   : > { %p1845_p9 = scmp.ge.s32.totalorder %s1577_s12, 2  ;;  %s953_s17 = scalar_lea.sflag [#allocation4], %s952_s15 }
 0x3b3   : > { %p1411_p10 = pnand %p1845_p9, %p1844_p7 }
 0x3b5   : > { %p1412_p12 = pneg %p1411_p10 }
 0x3b7   : > { %1560 = dma.done.wait (%p1412_p12), %s953_s17, 2048  }
 0x3b8   : > { %1562 = vsyncadd (%p1412_p12), %s953_s17, 4294965248  ;;  %p16_p13 = scmp.ge.s32.totalorder %s1655_s21, 4   ;;  %s1846_s9 = smov %s1569_s10 }
 0x3b9   : > { %s1847_s10 = smov %s1573_s11  ;;  %s1848_s11 = smov %s1675_s29 }
 0x3ba   : > { %s1849_s12 = smov %s1655_s21  ;;  %18 = sbr.rel (!%p16_p13) target bundleno = 6 (0x6), region = 77 }
 0x3bf   :  { %958 = vsyncpa [#allocation3], 1 }
 0x3c0   :  { %960 = vsyncpa [#allocation3 + $0x1], 1 }
 0x3c1   :  { %961 = vsyncpa [#allocation6], 1 }
 0x3c2   :  { %962 = vsyncpa [#allocation4], 1 }
 0x3c3   :  { %964 = vsyncpa [#allocation4 + $0x1], 1 }

</bundles_post_ra>
